<compile_context>
chip_gen: v6e
topology: v6e:2x2x1
jax: 0.10.0
libtpu: 0.0.40
codegen_flags: <defaults>
</compile_context>

<pallas_src>
import functools
import numpy as np

import jax
import jax.numpy as jnp
from jax import lax
from jax.experimental import pallas as pl
from jax.experimental.pallas import tpu as pltpu


# -----------------------------------------------------------------------------
# Packed parameter column layout (shared by the host packer and the kernel).
# -----------------------------------------------------------------------------
def _param_layout(DF, F, H1, H2):
    """name -> (row offset, length) inside the packed (P, 1) f32 column.

    Offsets are 8-sublane aligned so the static in-kernel slices never straddle
    a vreg row group."""
    sizes = [("bnb", DF), ("cbf", F), ("s1", H1), ("t1", H1),
             ("s2", H2), ("t2", H2), ("wo", H2), ("bo", 1)]
    layout, off = {}, 0
    for name, n in sizes:
        layout[name] = (off, n)
        off += -(-n // 8) * 8
    return layout, off


# -----------------------------------------------------------------------------
# Pallas kernel (features on sublanes, batch tile TB on lanes)
# -----------------------------------------------------------------------------
def adafs_kernel(gidx_ref,      # (F, TB)  int32  global ids (offsets folded in) -- streamed
                 w_emb_ref,     # (DF, V)  bf16   field-expanded, BN-scale-folded emb table
                 wc_emb_ref,    # (F, V)   bf16   controller weights folded onto the table
                 w1_ref,        # (H1, DF) bf16
                 w2_ref,        # (H2, H1) bf16
                 rep_ref,       # (DF, F)  bf16   0/1 replication matrix (row d*F+f -> field f)
                 prm_ref,       # (P, 1)   f32    packed per-channel vectors
                 out_ref):      # (1, TB)  f32
    DF, V = w_emb_ref.shape
    F = wc_emb_ref.shape[0]
    TB = gidx_ref.shape[1]
    lay, _ = _param_layout(DF, F, w1_ref.shape[0], w2_ref.shape[0])

    def prm(name):
        off, n = lay[name]
        return prm_ref[off:off + n, :]           # static 8-aligned slice -> (n, 1)

    # ---- Fused embedding gather: per-field one-hot columns over the (disjoint)
    # global vocab ranges, summed, so ONE (DF, V) x (V, TB) MXU matmul yields
    # all F fields at once in the torch d*F+f flatten order.
    gidx = gidx_ref[...]                                                        # (F, TB)
    viota = lax.broadcasted_iota(jnp.int32, (V, TB), 0)
    onehot = (viota == gidx[0:1, :]).astype(jnp.float32)
    for f in range(1, F):                                                       # F tiny & static
        onehot = onehot + (viota == gidx[f:f + 1, :]).astype(jnp.float32)
    onehot = onehot.astype(jnp.bfloat16)                                        # exact 0/1

    # ---- Controller (Linear + emb-BN + BN(F) + bias all folded host-side):
    # consumes the one-hot directly, then ReLU + softmax over the field axis.
    z = jnp.dot(wc_emb_ref[...], onehot, preferred_element_type=jnp.float32)    # (F, TB)
    z = jnp.maximum(z + prm("cbf"), 0.0)
    z = z - jnp.max(z, axis=0, keepdims=True)
    e = jnp.exp(z)
    w = e * pl.reciprocal(jnp.sum(e, axis=0, keepdims=True), approx=True)       # (F, TB)

    # ---- Embedded fields (BN scale already folded into w_emb; add BN shift).
    field = jnp.dot(w_emb_ref[...], onehot,
                    preferred_element_type=jnp.float32) + prm("bnb")            # (DF, TB)

    # ---- Field reweighting: replicate softmax row f to rows d*F+f via a tiny
    # resident 0/1 matmul on the MXU (no sublane concatenation / XLU copies).
    wcols = jnp.dot(rep_ref[...], w.astype(jnp.bfloat16),
                    preferred_element_type=jnp.float32)                         # (DF, TB)
    fieldw = (field * wcols).astype(jnp.bfloat16)

    # ---- Main MLP: [Linear -> BN(+bias folded) -> ReLU -> (Dropout=id)] x2
    h = jnp.dot(w1_ref[...], fieldw, preferred_element_type=jnp.float32)        # (H1, TB)
    h = jnp.maximum(h * prm("s1") + prm("t1"), 0.0)
    h = jnp.dot(w2_ref[...], h.astype(jnp.bfloat16),
                preferred_element_type=jnp.float32)                             # (H2, TB)
    h = jnp.maximum(h * prm("s2") + prm("t2"), 0.0)

    # ---- Final Linear(H2, 1): multiply + sublane reduce, sigmoid on the EUP.
    o = jnp.sum(h * prm("wo"), axis=0, keepdims=True) + prm("bo")               # (1, TB)
    out_ref[...] = pl.reciprocal(1.0 + jnp.exp(-o), approx=True)                # lane-dense store


# -----------------------------------------------------------------------------
# Wrapper: pallas_call with the index slab as the only streamed operand
# -----------------------------------------------------------------------------
def adafs_soft_forward(field_idx, kp, tb=4096):
    """field_idx: (B, F) int; kp: dict from prepare_kernel_params."""
    B, F = field_idx.shape
    DF, V = kp["w_emb"].shape
    H1 = kp["w1"].shape[0]
    H2 = kp["w2"].shape[0]
    P = kp["prm"].shape[0]

    # Batch tile on the lane axis: multiple of 128, default 4096 (sweep 2048-8192);
    # capped so small batches still give >= ~8 grid steps (v7x has 2 TCs and the
    # streamed index DMA stays double-buffered).
    tb = max(128, (tb // 128) * 128)
    cap = max(128, (B // 8) // 128 * 128)
    TB = min(tb, cap)
    B_pad = pl.cdiv(B, TB) * TB
    grid = (B_pad // TB,)

    # Only streamed HBM operand: global ids, field-rows x batch-lanes.
    gidx = (field_idx.astype(jnp.int32) + kp["offsets"][None, :]).T        # (F, B)
    if B_pad != B:
        gidx = jnp.pad(gidx, ((0, 0), (0, B_pad - B)))                     # pad id 0 is valid

    def res(shape):
        # resident parameter block: same block index every grid step (no re-DMA)
        return pl.BlockSpec(shape, lambda i: (0, 0))

    out = pl.pallas_call(
        adafs_kernel,
        out_shape=jax.ShapeDtypeStruct((1, B_pad), jnp.float32),
        grid=grid,
        in_specs=[
            pl.BlockSpec((F, TB), lambda i: (0, i)),     # gidx (the streamed operand)
            res((DF, V)),                                # w_emb   (BN-scaled, expanded)
            res((F, V)),                                 # wc_emb  (controller fold)
            res((H1, DF)),                               # w1
            res((H2, H1)),                               # w2
            res((DF, F)),                                # rep (0/1 replication)
            res((P, 1)),                                 # packed per-channel vectors
        ],
        out_specs=pl.BlockSpec((1, TB), lambda i: (0, i)),
        compiler_params=pltpu.CompilerParams(
            dimension_semantics=("parallel",),           # batch tiles independent
            # ~0.6 KiB x TB of live intermediates + tiny resident weights:
            # 32 MiB leaves headroom even on v7x's 64 MiB VMEM up to TB ~ 32K.
            vmem_limit_bytes=32 * 1024 * 1024,
        ),
    )(gidx, kp["w_emb"], kp["wc_emb"], kp["w1"], kp["w2"], kp["rep"], kp["prm"])

    return out[0, :B]                                    # torch .squeeze(1)


# -----------------------------------------------------------------------------
# Deterministic synthetic "raw" parameters (torch layouts, eval-mode BN folded)
# -----------------------------------------------------------------------------
def make_params(key, field_dims, embed_dim, mlp_dims):
    F = len(field_dims)
    D = embed_dim
    DF = D * F
    H1, H2 = mlp_dims

    keys = iter(jax.random.split(key, 32))
    nk = lambda: next(keys)

    def xavier_uniform(shape):
        fan_in, fan_out = shape
        lim = float(np.sqrt(6.0 / (fan_in + fan_out)))
        return jax.random.uniform(nk(), shape, jnp.float32, -lim, lim)

    def xavier_normal(shape):            # torch Linear weight layout: (out, in)
        fan_out, fan_in = shape
        std = float(np.sqrt(2.0 / (fan_in + fan_out)))
        return std * jax.random.normal(nk(), shape, jnp.float32)

    def bn(n):                           # eval-mode BatchNorm folded to scale/shift
        gamma = 1.0 + 0.1 * jax.random.normal(nk(), (n,), jnp.float32)
        beta = 0.1 * jax.random.normal(nk(), (n,), jnp.float32)
        mean = 0.1 * jax.random.normal(nk(), (n,), jnp.float32)
        var = 0.5 + jax.random.uniform(nk(), (n,), jnp.float32)
        scale = gamma / jnp.sqrt(var + 1e-5)
        shift = beta - mean * scale
        return scale, shift

    def bias(n):
        return 0.05 * jax.random.normal(nk(), (n,), jnp.float32)

    offsets = jnp.asarray(
        np.concatenate([[0], np.cumsum(field_dims)[:-1]]).astype(np.int32))

    emb_table = xavier_uniform((int(sum(field_dims)), D))            # (V, D)
    s_emb, t_emb = bn(D)                                             # BN1d(embed_dim)

    wc = xavier_normal((F, DF)); bc = bias(F); cs, cb = bn(F)        # controller
    w1 = xavier_normal((H1, DF)); b1 = bias(H1); s1, t1 = bn(H1)
    w2 = xavier_normal((H2, H1)); b2 = bias(H2); s2, t2 = bn(H2)
    wo = xavier_normal((1, H2))
    bo = 0.05 * jax.random.normal(nk(), (), jnp.float32)

    return dict(offsets=offsets, emb_table=emb_table, s_emb=s_emb, t_emb=t_emb,
                wc=wc, bc=bc, cs=cs, cb=cb,
                w1=w1, b1=b1, s1=s1, t1=t1,
                w2=w2, b2=b2, s2=s2, t2=t2,
                wo=wo, bo=bo)


# -----------------------------------------------------------------------------
# Host-side folds (numpy, done once): expanded table, controller fold, packing
# -----------------------------------------------------------------------------
def prepare_kernel_params(p, field_dims):
    pn = {k: np.asarray(v) for k, v in p.items()}
    F = len(field_dims)
    V, D = pn["emb_table"].shape
    DF = D * F
    H1 = pn["w1"].shape[0]
    H2 = pn["w2"].shape[0]
    V_pad = -(-V // 8) * 8                        # pad combined vocab to 8 sublanes

    # Field-expanded, BN-scale-folded embedding matrix: row d*F+f holds channel d
    # of field f's vocab slice, scaled by the emb-BN scale for channel d.
    w_emb = np.zeros((DF, V_pad), np.float32)
    for f in range(F):
        lo = int(pn["offsets"][f]); hi = lo + int(field_dims[f])
        rows = np.arange(D) * F + f
        w_emb[rows[:, None], np.arange(lo, hi)[None, :]] = \
            (pn["emb_table"][lo:hi, :] * pn["s_emb"][None, :]).T
    bnb = np.repeat(pn["t_emb"], F)                                   # emb-BN shift, (DF,)

    # Controller fold (consumes the one-hot directly):
    #   z = cs * (wc @ BN(emb) + bc) + cb = wc_emb @ onehot + cbf
    wc_emb = pn["cs"][:, None] * (pn["wc"] @ w_emb)                   # (F, V_pad)
    cbf = pn["cs"] * (pn["wc"] @ bnb + pn["bc"]) + pn["cb"]           # (F,)

    rep = np.tile(np.eye(F, dtype=np.float32), (D, 1))                # (DF, F), row d*F+f -> f

    lay, P = _param_layout(DF, F, H1, H2)
    prm = np.zeros((P, 1), np.float32)

    def put(name, vec):
        off, n = lay[name]
        prm[off:off + n, 0] = np.asarray(vec, np.float32).reshape(-1)

    put("bnb", bnb)
    put("cbf", cbf)
    put("s1", pn["s1"]); put("t1", pn["b1"] * pn["s1"] + pn["t1"])
    put("s2", pn["s2"]); put("t2", pn["b2"] * pn["s2"] + pn["t2"])
    put("wo", pn["wo"]); put("bo", [pn["bo"]])

    bf16 = jnp.bfloat16
    return dict(offsets=jnp.asarray(pn["offsets"], jnp.int32),
                w_emb=jnp.asarray(w_emb, bf16),
                wc_emb=jnp.asarray(wc_emb, bf16),
                w1=jnp.asarray(pn["w1"], bf16),
                w2=jnp.asarray(pn["w2"], bf16),
                rep=jnp.asarray(rep, bf16),
                prm=jnp.asarray(prm, jnp.float32))


# -----------------------------------------------------------------------------
# Pure-JAX f32 reference (mirrors the PyTorch forward in eval mode)
# -----------------------------------------------------------------------------
def reference_forward(field_idx, p):
    dot = functools.partial(jnp.dot, precision=lax.Precision.HIGHEST)
    idx = field_idx + p["offsets"][None, :]
    emb = p["emb_table"][idx]                                   # (B, F, D)
    field3 = jnp.transpose(emb, (0, 2, 1))                      # (B, D, F) = EMB output
    B, D, F = field3.shape
    field3 = field3 * p["s_emb"][None, :, None] + p["t_emb"][None, :, None]   # BN1d(D), eval
    flat = field3.reshape(B, D * F)                             # torch flatten: col d*F+f

    c = dot(flat, p["wc"].T) + p["bc"][None, :]                 # controller Linear
    c = jnp.maximum(c * p["cs"][None, :] + p["cb"][None, :], 0.0)   # BN + ReLU
    w = jax.nn.softmax(c, axis=1)                               # (B, F)

    field3 = field3 * w[:, None, :]                             # field * weight.unsqueeze(1)
    flat = field3.reshape(B, D * F)

    h = jnp.maximum((dot(flat, p["w1"].T) + p["b1"]) * p["s1"] + p["t1"], 0.0)
    h = jnp.maximum((dot(h, p["w2"].T) + p["b2"]) * p["s2"] + p["t2"], 0.0)
    o = dot(h, p["wo"].T)[:, 0] + p["bo"]
    return jax.nn.sigmoid(o)


if __name__ == "__main__":
    key = jax.random.PRNGKey(0)
    field_dims = [3, 5, 7, 4]      # F = 4 fields, combined vocab 19
    embed_dim = 8                  # D
    mlp_dims = [16, 8]             # main MLP hidden sizes
    B = 4096                       # -> TB = 512, 8 grid steps

    k_param, k_idx = jax.random.split(key)
    raw = make_params(k_param, field_dims, embed_dim, mlp_dims)
    kparams = prepare_kernel_params(raw, field_dims)

    idx_keys = jax.random.split(k_idx, len(field_dims))
    cols = [jax.random.randint(idx_keys[f], (B,), 0, field_dims[f], dtype=jnp.int32)
            for f in range(len(field_dims))]
    field_idx = jnp.stack(cols, axis=1)                         # (B, F) int32

    fwd = jax.jit(adafs_soft_forward)
    out = jax.block_until_ready(fwd(field_idx, kparams))

    ref = reference_forward(field_idx, raw)
    # bf16 table/weights into the MXU (f32 accumulation) + approx reciprocals
    # vs the f32 reference.
    np.testing.assert_allclose(np.asarray(out), np.asarray(ref), rtol=2e-2, atol=2e-2)

    print("KERNEL_OK")
</pallas_src>

<mosaic_0001>
module attributes {stable_mosaic.version = 11 : i64} {
  func.func @adafs_kernel(%arg0: i32, %arg1: memref<4x512xi32, #tpu.memory_space<vmem>>, %arg2: memref<32x24xbf16, #tpu.memory_space<vmem>>, %arg3: memref<4x24xbf16, #tpu.memory_space<vmem>>, %arg4: memref<16x32xbf16, #tpu.memory_space<vmem>>, %arg5: memref<8x16xbf16, #tpu.memory_space<vmem>>, %arg6: memref<32x4xbf16, #tpu.memory_space<vmem>>, %arg7: memref<104x1xf32, #tpu.memory_space<vmem>>, %arg8: memref<1x512xf32, #tpu.memory_space<vmem>>) attributes {dimension_semantics = [#tpu.dimension_semantics<parallel>], iteration_bounds = array<i64: 8>, scalar_prefetch = 0 : i64, scratch_operands = 0 : i64, tpu.core_type = #tpu.core_type<tc>, window_params = [{transform_indices = @transform_0, window_bounds = array<i64: 4, 512>}, {pipeline_mode = #tpu.pipeline_mode<synchronous>, transform_indices = @transform_1, window_bounds = array<i64: 32, 24>}, {pipeline_mode = #tpu.pipeline_mode<synchronous>, transform_indices = @transform_2, window_bounds = array<i64: 4, 24>}, {pipeline_mode = #tpu.pipeline_mode<synchronous>, transform_indices = @transform_3, window_bounds = array<i64: 16, 32>}, {pipeline_mode = #tpu.pipeline_mode<synchronous>, transform_indices = @transform_4, window_bounds = array<i64: 8, 16>}, {pipeline_mode = #tpu.pipeline_mode<synchronous>, transform_indices = @transform_5, window_bounds = array<i64: 32, 4>}, {pipeline_mode = #tpu.pipeline_mode<synchronous>, transform_indices = @transform_6, window_bounds = array<i64: 104, 1>}, {transform_indices = @transform_7, window_bounds = array<i64: 1, 512>}]} {
    %c0 = arith.constant 0 : index
    %c0_0 = arith.constant 0 : index
    %0 = vector.load %arg1[%c0, %c0_0] : memref<4x512xi32, #tpu.memory_space<vmem>>, vector<4x512xi32>
    %1 = tpu.iota {dimensions = array<i32: 0>} : vector<24x512xi32>
    %2 = vector.extract_strided_slice %0 {offsets = [0, 0], sizes = [1, 512], strides = [1, 1]} : vector<4x512xi32> to vector<1x512xi32>
    %3 = vector.broadcast %2 : vector<1x512xi32> to vector<24x512xi32>
    %4 = arith.cmpi eq, %1, %3 : vector<24x512xi32>
    %5 = arith.extui %4 : vector<24x512xi1> to vector<24x512xi32>
    %6 = arith.sitofp %5 : vector<24x512xi32> to vector<24x512xf32>
    %7 = vector.extract_strided_slice %0 {offsets = [1, 0], sizes = [1, 512], strides = [1, 1]} : vector<4x512xi32> to vector<1x512xi32>
    %8 = vector.broadcast %7 : vector<1x512xi32> to vector<24x512xi32>
    %9 = arith.cmpi eq, %1, %8 : vector<24x512xi32>
    %10 = arith.extui %9 : vector<24x512xi1> to vector<24x512xi32>
    %11 = arith.sitofp %10 : vector<24x512xi32> to vector<24x512xf32>
    %12 = arith.addf %6, %11 : vector<24x512xf32>
    %13 = vector.extract_strided_slice %0 {offsets = [2, 0], sizes = [1, 512], strides = [1, 1]} : vector<4x512xi32> to vector<1x512xi32>
    %14 = vector.broadcast %13 : vector<1x512xi32> to vector<24x512xi32>
    %15 = arith.cmpi eq, %1, %14 : vector<24x512xi32>
    %16 = arith.extui %15 : vector<24x512xi1> to vector<24x512xi32>
    %17 = arith.sitofp %16 : vector<24x512xi32> to vector<24x512xf32>
    %18 = arith.addf %12, %17 : vector<24x512xf32>
    %19 = vector.extract_strided_slice %0 {offsets = [3, 0], sizes = [1, 512], strides = [1, 1]} : vector<4x512xi32> to vector<1x512xi32>
    %20 = vector.broadcast %19 : vector<1x512xi32> to vector<24x512xi32>
    %21 = arith.cmpi eq, %1, %20 : vector<24x512xi32>
    %22 = arith.extui %21 : vector<24x512xi1> to vector<24x512xi32>
    %23 = arith.sitofp %22 : vector<24x512xi32> to vector<24x512xf32>
    %24 = arith.addf %18, %23 : vector<24x512xf32>
    %25 = arith.truncf %24 : vector<24x512xf32> to vector<24x512xbf16>
    %c0_1 = arith.constant 0 : index
    %c0_2 = arith.constant 0 : index
    %26 = vector.load %arg3[%c0_1, %c0_2] : memref<4x24xbf16, #tpu.memory_space<vmem>>, vector<4x24xbf16>
    %cst = arith.constant dense<0.000000e+00> : vector<4x512xf32>
    %27 = tpu.matmul %26, %25, %cst {dimension_numbers = #tpu.dot_dimension_numbers<[1], [0], [0], [1], [0, 0, 1, 1], [], []>} : vector<4x24xbf16>, vector<24x512xbf16>, vector<4x512xf32> -> vector<4x512xf32>
    %c32 = arith.constant 32 : index
    %c0_3 = arith.constant 0 : index
    %28 = vector.load %arg7[%c32, %c0_3] : memref<104x1xf32, #tpu.memory_space<vmem>>, vector<4x1xf32>
    %29 = vector.broadcast %28 : vector<4x1xf32> to vector<4x512xf32>
    %30 = arith.addf %27, %29 : vector<4x512xf32>
    %cst_4 = arith.constant 0.000000e+00 : f32
    %31 = vector.broadcast %cst_4 : f32 to vector<4x512xf32>
    %32 = arith.maximumf %30, %31 : vector<4x512xf32>
    %cst_5 = arith.constant dense<0xFF800000> : vector<512xf32>
    %33 = vector.multi_reduction <maximumf>, %32, %cst_5 [0] : vector<4x512xf32> to vector<512xf32>
    %34 = vector.shape_cast %33 : vector<512xf32> to vector<1x512xf32>
    %35 = vector.broadcast %34 : vector<1x512xf32> to vector<4x512xf32>
    %36 = arith.subf %32, %35 : vector<4x512xf32>
    %37 = math.exp %36 : vector<4x512xf32>
    %cst_6 = arith.constant dense<0.000000e+00> : vector<512xf32>
    %38 = vector.multi_reduction <add>, %37, %cst_6 [0] : vector<4x512xf32> to vector<512xf32>
    %39 = vector.shape_cast %38 : vector<512xf32> to vector<1x512xf32>
    %40 = tpu.reciprocal %39 {approx = true} : vector<1x512xf32> -> vector<1x512xf32>
    %41 = vector.broadcast %40 : vector<1x512xf32> to vector<4x512xf32>
    %42 = arith.mulf %37, %41 : vector<4x512xf32>
    %c0_7 = arith.constant 0 : index
    %c0_8 = arith.constant 0 : index
    %43 = vector.load %arg2[%c0_7, %c0_8] : memref<32x24xbf16, #tpu.memory_space<vmem>>, vector<32x24xbf16>
    %cst_9 = arith.constant dense<0.000000e+00> : vector<32x512xf32>
    %44 = tpu.matmul %43, %25, %cst_9 {dimension_numbers = #tpu.dot_dimension_numbers<[1], [0], [0], [1], [0, 0, 1, 1], [], []>} : vector<32x24xbf16>, vector<24x512xbf16>, vector<32x512xf32> -> vector<32x512xf32>
    %c0_10 = arith.constant 0 : index
    %c0_11 = arith.constant 0 : index
    %45 = vector.load %arg7[%c0_10, %c0_11] : memref<104x1xf32, #tpu.memory_space<vmem>>, vector<32x1xf32>
    %46 = vector.broadcast %45 : vector<32x1xf32> to vector<32x512xf32>
    %47 = arith.addf %44, %46 : vector<32x512xf32>
    %c0_12 = arith.constant 0 : index
    %c0_13 = arith.constant 0 : index
    %48 = vector.load %arg6[%c0_12, %c0_13] : memref<32x4xbf16, #tpu.memory_space<vmem>>, vector<32x4xbf16>
    %49 = arith.truncf %42 : vector<4x512xf32> to vector<4x512xbf16>
    %cst_14 = arith.constant dense<0.000000e+00> : vector<32x512xf32>
    %50 = tpu.matmul %48, %49, %cst_14 {dimension_numbers = #tpu.dot_dimension_numbers<[1], [0], [0], [1], [0, 0, 1, 1], [], []>} : vector<32x4xbf16>, vector<4x512xbf16>, vector<32x512xf32> -> vector<32x512xf32>
    %51 = arith.mulf %47, %50 : vector<32x512xf32>
    %52 = arith.truncf %51 : vector<32x512xf32> to vector<32x512xbf16>
    %c0_15 = arith.constant 0 : index
    %c0_16 = arith.constant 0 : index
    %53 = vector.load %arg4[%c0_15, %c0_16] : memref<16x32xbf16, #tpu.memory_space<vmem>>, vector<16x32xbf16>
    %cst_17 = arith.constant dense<0.000000e+00> : vector<16x512xf32>
    %54 = tpu.matmul %53, %52, %cst_17 {dimension_numbers = #tpu.dot_dimension_numbers<[1], [0], [0], [1], [0, 0, 1, 1], [], []>} : vector<16x32xbf16>, vector<32x512xbf16>, vector<16x512xf32> -> vector<16x512xf32>
    %c40 = arith.constant 40 : index
    %c0_18 = arith.constant 0 : index
    %55 = vector.load %arg7[%c40, %c0_18] : memref<104x1xf32, #tpu.memory_space<vmem>>, vector<16x1xf32>
    %56 = vector.broadcast %55 : vector<16x1xf32> to vector<16x512xf32>
    %57 = arith.mulf %54, %56 : vector<16x512xf32>
    %c56 = arith.constant 56 : index
    %c0_19 = arith.constant 0 : index
    %58 = vector.load %arg7[%c56, %c0_19] : memref<104x1xf32, #tpu.memory_space<vmem>>, vector<16x1xf32>
    %59 = vector.broadcast %58 : vector<16x1xf32> to vector<16x512xf32>
    %60 = arith.addf %57, %59 : vector<16x512xf32>
    %cst_20 = arith.constant 0.000000e+00 : f32
    %61 = vector.broadcast %cst_20 : f32 to vector<16x512xf32>
    %62 = arith.maximumf %60, %61 : vector<16x512xf32>
    %c0_21 = arith.constant 0 : index
    %c0_22 = arith.constant 0 : index
    %63 = vector.load %arg5[%c0_21, %c0_22] : memref<8x16xbf16, #tpu.memory_space<vmem>>, vector<8x16xbf16>
    %64 = arith.truncf %62 : vector<16x512xf32> to vector<16x512xbf16>
    %cst_23 = arith.constant dense<0.000000e+00> : vector<8x512xf32>
    %65 = tpu.matmul %63, %64, %cst_23 {dimension_numbers = #tpu.dot_dimension_numbers<[1], [0], [0], [1], [0, 0, 1, 1], [], []>} : vector<8x16xbf16>, vector<16x512xbf16>, vector<8x512xf32> -> vector<8x512xf32>
    %c72 = arith.constant 72 : index
    %c0_24 = arith.constant 0 : index
    %66 = vector.load %arg7[%c72, %c0_24] : memref<104x1xf32, #tpu.memory_space<vmem>>, vector<8x1xf32>
    %67 = vector.broadcast %66 : vector<8x1xf32> to vector<8x512xf32>
    %68 = arith.mulf %65, %67 : vector<8x512xf32>
    %c80 = arith.constant 80 : index
    %c0_25 = arith.constant 0 : index
    %69 = vector.load %arg7[%c80, %c0_25] : memref<104x1xf32, #tpu.memory_space<vmem>>, vector<8x1xf32>
    %70 = vector.broadcast %69 : vector<8x1xf32> to vector<8x512xf32>
    %71 = arith.addf %68, %70 : vector<8x512xf32>
    %cst_26 = arith.constant 0.000000e+00 : f32
    %72 = vector.broadcast %cst_26 : f32 to vector<8x512xf32>
    %73 = arith.maximumf %71, %72 : vector<8x512xf32>
    %c88 = arith.constant 88 : index
    %c0_27 = arith.constant 0 : index
    %74 = vector.load %arg7[%c88, %c0_27] : memref<104x1xf32, #tpu.memory_space<vmem>>, vector<8x1xf32>
    %75 = vector.broadcast %74 : vector<8x1xf32> to vector<8x512xf32>
    %76 = arith.mulf %73, %75 : vector<8x512xf32>
    %cst_28 = arith.constant dense<0.000000e+00> : vector<512xf32>
    %77 = vector.multi_reduction <add>, %76, %cst_28 [0] : vector<8x512xf32> to vector<512xf32>
    %78 = vector.shape_cast %77 : vector<512xf32> to vector<1x512xf32>
    %c96 = arith.constant 96 : index
    %c0_29 = arith.constant 0 : index
    %79 = vector.load %arg7[%c96, %c0_29] : memref<104x1xf32, #tpu.memory_space<vmem>>, vector<1x1xf32>
    %80 = vector.broadcast %79 : vector<1x1xf32> to vector<1x512xf32>
    %81 = arith.addf %78, %80 : vector<1x512xf32>
    %cst_30 = arith.constant 0.000000e+00 : f32
    %82 = vector.broadcast %cst_30 : f32 to vector<1x512xf32>
    %83 = arith.subf %82, %81 : vector<1x512xf32>
    %84 = math.exp %83 : vector<1x512xf32>
    %cst_31 = arith.constant 1.000000e+00 : f32
    %85 = vector.broadcast %cst_31 : f32 to vector<1x512xf32>
    %86 = arith.addf %85, %84 : vector<1x512xf32>
    %87 = tpu.reciprocal %86 {approx = true} : vector<1x512xf32> -> vector<1x512xf32>
    %c0_32 = arith.constant 0 : index
    %c0_33 = arith.constant 0 : index
    %88 = vector.load %arg8[%c0_32, %c0_33] : memref<1x512xf32, #tpu.memory_space<vmem>>, vector<1x512xf32>
    tpu.vector_store %arg8[%c0_32, %c0_33], %87 {strides = array<i32>} : memref<1x512xf32, #tpu.memory_space<vmem>>, vector<1x512xf32>,
    return
  }
  func.func @transform_0(%arg0: i32) -> (i32, i32) {
    %c0_i32 = arith.constant 0 : i32
    %c0_i32_0 = arith.constant 0 : i32
    return %c0_i32, %arg0 : i32, i32
  }
  func.func @transform_1(%arg0: i32) -> (i32, i32) {
    %c0_i32 = arith.constant 0 : i32
    %c0_i32_0 = arith.constant 0 : i32
    %c0_i32_1 = arith.constant 0 : i32
    return %c0_i32, %c0_i32_0 : i32, i32
  }
  func.func @transform_2(%arg0: i32) -> (i32, i32) {
    %c0_i32 = arith.constant 0 : i32
    %c0_i32_0 = arith.constant 0 : i32
    %c0_i32_1 = arith.constant 0 : i32
    return %c0_i32, %c0_i32_0 : i32, i32
  }
  func.func @transform_3(%arg0: i32) -> (i32, i32) {
    %c0_i32 = arith.constant 0 : i32
    %c0_i32_0 = arith.constant 0 : i32
    %c0_i32_1 = arith.constant 0 : i32
    return %c0_i32, %c0_i32_0 : i32, i32
  }
  func.func @transform_4(%arg0: i32) -> (i32, i32) {
    %c0_i32 = arith.constant 0 : i32
    %c0_i32_0 = arith.constant 0 : i32
    %c0_i32_1 = arith.constant 0 : i32
    return %c0_i32, %c0_i32_0 : i32, i32
  }
  func.func @transform_5(%arg0: i32) -> (i32, i32) {
    %c0_i32 = arith.constant 0 : i32
    %c0_i32_0 = arith.constant 0 : i32
    %c0_i32_1 = arith.constant 0 : i32
    return %c0_i32, %c0_i32_0 : i32, i32
  }
  func.func @transform_6(%arg0: i32) -> (i32, i32) {
    %c0_i32 = arith.constant 0 : i32
    %c0_i32_0 = arith.constant 0 : i32
    %c0_i32_1 = arith.constant 0 : i32
    return %c0_i32, %c0_i32_0 : i32, i32
  }
  func.func @transform_7(%arg0: i32) -> (i32, i32) {
    %c0_i32 = arith.constant 0 : i32
    %c0_i32_0 = arith.constant 0 : i32
    return %c0_i32, %arg0 : i32, i32
  }
}

</mosaic_0001>

<bundles_post_ra>
// kernel: adafs_soft_forward.1
= control target key start
LH: loop header
LB: loop body
LE: loop exit
PB: predicated region body
PF: predicated region fallthrough
CT: control target
= control target key end

     0   :  { %12 = vsyncpa [#allocation3], 0  ;;  %s2258_s0 = inlined_call_operand.vmem [shape: s32[4,4096], index: 0, kind: input, shape index: {}]   ;;  %s2259_s1 = inlined_call_operand.vmem [shape: bf16[32,24], index: 1, kind: input, shape index: {}]   ;;  %s2260_s2 = inlined_call_operand.vmem [shape: bf16[4,24], index: 2, kind: input, shape index: {}]   ;;  %s2261_s3 = inlined_call_operand.vmem [shape: bf16[16,32], index: 3, kind: input, shape index: {}]   ;;  %s2262_s4 = inlined_call_operand.vmem [shape: bf16[8,16], index: 4, kind: input, shape index: {}]   ;;  %s2263_s5 = inlined_call_operand.vmem [shape: bf16[32,4], index: 5, kind: input, shape index: {}]   ;;  %s2264_s6 = inlined_call_operand.vmem [shape: f32[104,1], index: 6, kind: input, shape index: {}]   ;;  %s2265_s7 = inlined_call_operand.hbm [shape: f32[1,4096], index: 7, kind: output, shape index: {}]  }
   0x1   :  { %14 = vsyncpa [#allocation3 + $0x1], 0  ;;  %s1812_s24 = smov 0   ;;  %s1814_s25 = smov 0  }
   0x2   :  { %s1816_s26 = smov 0   ;;  %s1818_s27 = smov 0  }
   0x3 LB: > { %s1833_s28 = sadd.s32 4294967295, %s1766_s27   ;;  %s1539_s29 = sadd.s32 4294967294, %s1766_s27   ;;  %s1766_s27 = sphi %s1818_s27, %s2271_s27   ;;  %s1762_s26 = sphi %s1816_s26, %s2270_s26   ;;  %s1758_s25 = sphi %s1814_s25, %s2269_s25   ;;  %s1754_s24 = sphi %s1812_s24, %s2268_s24  }
   0x4   : > { %s1837_s30 = sadd.s32 1, %s1766_s27   ;;  %s179_s8 = sadd.s32 1, %s1762_s26 }
   0x5   : > { %s176_s9 = ssub.s32 %s1766_s27, %s1837_s30  ;;  %p189_p0 = scmp.ne.s32.totalorder %s1762_s26, %s1758_s25 }
   0x6   : > { %p177_p1 = scmp.eq.s32.totalorder %s176_s9, 0  ;;  %p190_p2 = scmp.eq.s32.totalorder %s1833_s28, 7 }
   0x7   : > { %p195_p3 = scmp.ne.s32.totalorder %s1758_s25, %s1754_s24  ;;  %p196_p4 = scmp.eq.s32.totalorder %s1539_s29, 7 }
   0x8   : > { %s1848_s10 = scalar_select %p177_p1, %s1762_s26, %s179_s8  }
   0x9   : > { %p1850_p5 = por %p190_p2, %p189_p0  ;;  %p1854_p6 = por %p196_p4, %p195_p3 }
   0xa   : > { %p1542_p7 = scmp.ge.s32.totalorder %s1766_s27, 1  ;;  %p241_p8 = scmp.lt.s32.totalorder %s1766_s27, 9 }
   0xc   : > { %p242_p9 = pnand %p1542_p7, %p241_p8 }
   0xd   : > { %s1544_s13 = sshll.u32 (!%p242_p9), %s1833_s28, 2  ;;  %s1624_s18 = sshll.u32 (!%p242_p9), %s1833_s28, 6 }
   0xe   : > { %245 = sbr.rel (%p242_p9) target bundleno = 1043 (0x413), region = 48  ;;  %p274_p10 = scmp.lt.s32.totalorder (!%p242_p9), %s1544_s13, 31 }
   0xf   : > { %s1478_s23 = scalar_lea.hbm (!%p242_p9), %s2265_s7, %s1624_s18  ;;  %s1771_s9 = smov (!%p242_p9), [#allocation2]  }
  0x10   : > { %s1710_s28 = sshll.u32 (!%p242_p9), %s1771_s9, 4  ;;  %s1711_s28 = int_to_ptr.vmem [resolvable:$false] %s1710_s28 }
  0x13   : > { %v283_v0 = vlaneseq  ;;  %v1768_v1 = vmov 0   ;;  %s2273_s13 = smov (!%p274_p10, %s1544_s13), 31  ;;  %v604_v3 = vld [vmem:[%s2264_s6 + $0x20] sm:$0xf]  ;;  %v795_v8 = vld [vmem:[%s2264_s6 + $0x10] sm:$0xff]  ;;  %v794_v25 = vld [vmem:[%s2264_s6 + $0x8] sm:$0xff] }
  0x14   : > { %659 = vmatprep.mubr.bf16.mxu0 %v1768_v1  ;;  %700 = vmatprep.mubr.bf16.mxu1 %v1768_v1  ;;  %s1545_s16 = sshll.u32 %s2273_s13, 2  ;;  %vm614_vm0 = vcmask 1043456   ;;  %v1769_v34 = vmov 0.0   ;;  %v1205_v39 = vld [vmem:[%s2264_s6 + $0x30] sm:$0xff]  ;;  %v1225_v52 = vld [vmem:[%s2264_s6 + $0x40] sm:$0xff]  ;;  %s1712_s13 = scalar_lea.vmem %s1711_s28, 128 }
  0x15   : > { %v1864_v2 = vshrl.u32 %v283_v0, 7  ;;  %1667 = vset.pattern.permute.xlu0 %v1768_v1  ;;  %1668 = vset.pattern.permute.xlu1 %v1768_v1  ;;  %s277_s21 = scalar_lea.vmem %s2258_s0, %s1545_s16  ;;  %s270_s16 = sand.u32 1, %s1758_s25  }
  0x16   : > { %607 = vperm.xlu0 %1667, %v604_v3   ;;  %v281_v13 = vld [vmem:[%s277_s21] sm:$0xff]  ;;  %v1896_v15 = vld [vmem:[%s277_s21 + $0x8] sm:$0xff]  ;;  %s1543_s17 = sshll.u32 %s270_s16, 2  ;;  %s1466_s29 = scalar_lea.sflag [#allocation3], %s270_s16 }
  0x17   : > { %v293_v4 = vsub.s32 4, %v1864_v2  ;;  %v1873_v5 = vadd.s32 16, %v1864_v2  ;;  %v361_v6 = vsub.s32 5, %v1864_v2  ;;  %v441_v7 = vsub.s32 6, %v1864_v2  ;;  %s272_s19 = scalar_lea.vmem [#allocation2], %s1543_s17 }
  0x18   : > { %v1884_v9 = vsub.s32 0, %v1864_v2  ;;  %v1887_v10 = vsub.s32 1, %v1864_v2  ;;  %v1890_v11 = vsub.s32 2, %v1864_v2  ;;  %v521_v12 = vsub.s32 7, %v1864_v2  ;;  %s1480_s20 = sshll.u32 %s272_s19, 4  ;;  %s1481_s20 = int_to_ptr.vmem [resolvable:$true] %s1480_s20 }
  0x19   : > { %v1894_v14 = vsub.s32 3, %v1864_v2  ;;  %v1899_v16 = vadd.s32 8, %v1864_v2  ;;  %v294_v17 = vrot.slane %v281_v13, %v293_v4  ;;  %v362_v18 = vrot.slane %v281_v13, %v361_v6  ;;  %s1706_s8 = scalar_lea.vmem %s1481_s20, 64  ;;  %p1713_p0 = scmp.lt.s32.totalorder %s1481_s20, %s1711_s28 }
  0x1a   : > { %v442_v19 = vrot.slane %v281_v13, %v441_v7  ;;  %v522_v20 = vrot.slane %v281_v13, %v521_v12  ;;  %809 = vperm.xlu0 %1667, %v795_v8   ;;  %v302_v21 = vrot.slane %v1896_v15, %v293_v4  ;;  %v370_v22 = vrot.slane %v1896_v15, %v361_v6  ;;  %v1353_v4 = vld [vmem:[%s2264_s6 + $0x50] sm:$0xff]  ;;  %p1707_p11 = scmp.ne.s32.totalorder %s1481_s20, %s1706_s8  ;;  %p1714_p1 = scmp.lt.s32.totalorder %s1712_s13, %s1706_s8 }
  0x1b   : > { %v450_v23 = vrot.slane %v1896_v15, %v441_v7  ;;  %v530_v24 = vrot.slane %v1896_v15, %v521_v12  ;;  %v1909_v26 = vrot.slane %v294_v17, %v1884_v9  ;;  %v1912_v27 = vrot.slane %v362_v18, %v1887_v10 }
  0x1c   : > { %v1915_v28 = vrot.slane %v442_v19, %v1890_v11  ;;  %v1918_v29 = vrot.slane %v522_v20, %v1894_v14  ;;  %v1921_v30 = vrot.slane %v302_v21, %v1884_v9  ;;  %v1924_v31 = vrot.slane %v370_v22, %v1887_v10  ;;  %v1401_v22 = vld [vmem:[%s2264_s6 + $0x60] sm:$0x1]  ;;  %p1708_p12 = pnand %p1707_p11, %p1850_p5  ;;  %p1715_p2 = por %p1714_p1, %p1713_p0 }
  0x1d   : > { %v1927_v32 = vrot.slane %v450_v23, %v1890_v11  ;;  %v1930_v33 = vrot.slane %v530_v24, %v1894_v14  ;;  %vm328_vm1 = vcmp.eq.s32.totalorder %v1873_v5, %v1909_v26  ;;  %vm396_vm2 = vcmp.eq.s32.totalorder %v1873_v5, %v1912_v27 }
  0x1e   : > { %vm476_vm3 = vcmp.eq.s32.totalorder %v1873_v5, %v1915_v28  ;;  %vm556_vm4 = vcmp.eq.s32.totalorder %v1873_v5, %v1918_v29  ;;  %804 = vperm.xlu0 %1667, %v794_v25   ;;  %v1555_v35 = vsel %vm328_vm1, 1.0, %v1769_v34  ;;  %v1567_v36 = vsel %vm396_vm2, 1.0, %v1769_v34  ;;  %p1709_p13 = pneg %p1708_p12 }
  0x1f   : > { %v1579_v37 = vsel %vm476_vm3, 1.0, %v1769_v34  ;;  %v1591_v38 = vsel %vm556_vm4, 1.0, %v1769_v34  ;;  %v432_v40 = vadd.f32 %v1567_v36, %v1555_v35  ;;  %vm330_vm5 = vcmp.eq.s32.totalorder %v1873_v5, %v1921_v30 }
  0x20   : > { %vm398_vm6 = vcmp.eq.s32.totalorder %v1873_v5, %v1924_v31  ;;  %vm478_vm7 = vcmp.eq.s32.totalorder %v1873_v5, %v1927_v32  ;;  %v1557_v41 = vsel %vm330_vm5, 1.0, %v1769_v34  ;;  %vm558_vm8 = vcmp.eq.s32.totalorder %v1873_v5, %v1930_v33  ;;  %p1716_p3 = pnand %p1715_p2, %p1709_p13 }
  0x21   : > { %v1569_v42 = vsel %vm398_vm6, 1.0, %v1769_v34  ;;  %v1581_v43 = vsel %vm478_vm7, 1.0, %v1769_v34  ;;  %v512_v44 = vadd.f32 %v1579_v37, %v432_v40  ;;  %v1593_v46 = vsel %vm558_vm8, 1.0, %v1769_v34 }
  0x22   : > { %v434_v45 = vadd.f32 %v1569_v42, %v1557_v41  ;;  %v290_v47 = vrot.slane %v281_v13, %v1884_v9  ;;  %1213 = vperm.xlu0 %1667, %v1205_v39   ;;  %v358_v48 = vrot.slane %v281_v13, %v1887_v10  ;;  %v438_v49 = vrot.slane %v281_v13, %v1890_v11 }
  0x23   : > { %v518_v50 = vrot.slane %v281_v13, %v1894_v14  ;;  %v298_v51 = vrot.slane %v1896_v15, %v1884_v9  ;;  %v592_v53 = vadd.f32 %v1591_v38, %v512_v44  ;;  %v366_v56 = vrot.slane %v1896_v15, %v1887_v10 }
  0x24   : > { %v514_v54 = vadd.f32 %v1581_v43, %v434_v45  ;;  %v1969_v55 = vrot.slane %v290_v47, %v1884_v9  ;;  %v1974_v57 = vrot.slane %v358_v48, %v1887_v10  ;;  %v1977_v58 = vrot.slane %v438_v49, %v1890_v11 }
  0x25   : > { %v1980_v59 = vrot.slane %v518_v50, %v1894_v14  ;;  %v1983_v60 = vrot.slane %v298_v51, %v1884_v9  ;;  %v1985_v61 = vpack.c.bf16 %v592_v53, %v592_v53  ;;  %v1990_v63 = vrot.slane %v366_v56, %v1887_v10 }
  0x26   : > { %v594_v62 = vadd.f32 %v1593_v46, %v514_v54  ;;  %vm327_vm9 = vcmp.eq.s32.totalorder %v1873_v5, %v1969_v55  ;;  %1233 = vperm.xlu0 %1667, %v1225_v52   ;;  %vm395_vm10 = vcmp.eq.s32.totalorder %v1873_v5, %v1974_v57  ;;  %vm475_vm11 = vcmp.eq.s32.totalorder %v1873_v5, %v1977_v58 }
  0x27   : > { %v1554_v3 = vsel %vm327_vm9, 1.0, %v1769_v34  ;;  %vm555_vm12 = vcmp.eq.s32.totalorder %v1873_v5, %v1980_v59  ;;  %1594 = vmatprep.subr.msk.bf16.mxu0 %vm614_vm0, %v1985_v61  ;;  %v1566_v7 = vsel %vm395_vm10, 1.0, %v1769_v34  ;;  %v1578_v8 = vsel %vm475_vm11, 1.0, %v1769_v34 }
  0x28   : > { %v2004_v6 = vpack.c.bf16 %v594_v62, %v594_v62  ;;  %v1590_v9 = vsel %vm555_vm12, 1.0, %v1769_v34  ;;  %v431_v10 = vadd.f32 %v1566_v7, %v1554_v3  ;;  %vm329_vm13 = vcmp.eq.s32.totalorder %v1873_v5, %v1983_v60 }
  0x29   : > { %vm397_vm14 = vcmp.eq.s32.totalorder %v1873_v5, %v1990_v63  ;;  %v446_v12 = vrot.slane %v1896_v15, %v1890_v11  ;;  %v1556_v13 = vsel %vm329_vm13, 1.0, %v1769_v34  ;;  %v526_v18 = vrot.slane %v1896_v15, %v1894_v14 }
  0x2a   : > { %1596 = vmatprep.subr.msk.bf16.mxu1 %vm614_vm0, %v2004_v6  ;;  %v1568_v17 = vsel %vm397_vm14, 1.0, %v1769_v34  ;;  %vm320_vm15 = vcmp.eq.s32.totalorder %v1864_v2, %v1909_v26  ;;  %1356 = vperm.xlu0 %1667, %v1353_v4   ;;  %v511_v19 = vadd.f32 %v1578_v8, %v431_v10  ;;  %vm324_vm1 = vcmp.eq.s32.totalorder %v1899_v16, %v1909_v26 }
  0x2b   : > { %v433_v20 = vadd.f32 %v1568_v17, %v1556_v13  ;;  %v2024_v21 = vrot.slane %v446_v12, %v1890_v11  ;;  %v2032_v23 = vrot.slane %v526_v18, %v1894_v14  ;;  %v1547_v15 = vsel %vm320_vm15, 1.0, %v1769_v34 }
  0x2c   : > { %v1551_v24 = vsel %vm324_vm1, 1.0, %v1769_v34  ;;  %vm388_vm2 = vcmp.eq.s32.totalorder %v1864_v2, %v1912_v27  ;;  %v591_v25 = vadd.f32 %v1590_v9, %v511_v19  ;;  %vm392_vm4 = vcmp.eq.s32.totalorder %v1899_v16, %v1912_v27 }
  0x2d   : > { %vm477_vm3 = vcmp.eq.s32.totalorder %v1873_v5, %v2024_v21  ;;  %v1559_v11 = vsel %vm388_vm2, 1.0, %v1769_v34  ;;  %vm557_vm5 = vcmp.eq.s32.totalorder %v1873_v5, %v2032_v23  ;;  %v1563_v14 = vsel %vm392_vm4, 1.0, %v1769_v34 }
  0x2e   : > { %v1580_v26 = vsel %vm477_vm3, 1.0, %v1769_v34  ;;  %v424_v35 = vadd.f32 %v1559_v11, %v1547_v15  ;;  %1404 = vperm.xlu0 %1667, %v1401_v22   ;;  %v599_v36 = vpack.c.bf16 %v591_v25, %v591_v25  ;;  %v1592_v38 = vsel %vm557_vm5, 1.0, %v1769_v34 }
  0x2f   : > { %v513_v37 = vadd.f32 %v1580_v26, %v433_v20  ;;  %v428_v39 = vadd.f32 %v1563_v14, %v1551_v24  ;;  %vm468_vm6 = vcmp.eq.s32.totalorder %v1864_v2, %v1915_v28  ;;  %vm472_vm7 = vcmp.eq.s32.totalorder %v1899_v16, %v1915_v28 }
  0x30   : > { %vm548_vm8 = vcmp.eq.s32.totalorder %v1864_v2, %v1918_v29  ;;  %vm552_vm9 = vcmp.eq.s32.totalorder %v1899_v16, %v1918_v29  ;;  %v2057_v5 = vsel %vm614_vm0, %v599_v36, 0  ;;  %v1571_v40 = vsel %vm468_vm6, 1.0, %v1769_v34 }
  0x31   : > { %v593_v27 = vadd.f32 %v1592_v38, %v513_v37  ;;  %v1575_v41 = vsel %vm472_vm7, 1.0, %v1769_v34  ;;  %640 = vmatpush1.bf16.msra.mxu0 %v2057_v5  ;;  %v504_v42 = vadd.f32 %v1571_v40, %v424_v35  ;;  %v1583_v28 = vsel %vm548_vm8, 1.0, %v1769_v34 }
  0x32   : > { %v508_v43 = vadd.f32 %v1575_v41, %v428_v39  ;;  %v1587_v44 = vsel %vm552_vm9, 1.0, %v1769_v34  ;;  %vm322_vm10 = vcmp.eq.s32.totalorder %v1864_v2, %v1921_v30  ;;  %vm326_vm11 = vcmp.eq.s32.totalorder %v1899_v16, %v1921_v30  ;;  %v603_v39 = vld [vmem:[%s2260_s2] sm:$0x3]  ;;  %v1224_v41 = vld [vmem:[%s2264_s6 + $0x38] sm:$0xff] }
  0x33   : > { %v601_v45 = vpack.c.bf16 %v593_v27, %v593_v27  ;;  %vm390_vm12 = vcmp.eq.s32.totalorder %v1864_v2, %v1924_v31  ;;  %v584_v29 = vadd.f32 %v1583_v28, %v504_v42  ;;  %v1549_v47 = vsel %vm322_vm10, 1.0, %v1769_v34  ;;  %v1343_v42 = vld [vmem:[%s2264_s6 + $0x48] sm:$0xff] }
  0x34   : > { %v588_v46 = vadd.f32 %v1587_v44, %v508_v43  ;;  %v1553_v48 = vsel %vm326_vm11, 1.0, %v1769_v34  ;;  %vm394_vm13 = vcmp.eq.s32.totalorder %v1899_v16, %v1924_v31  ;;  %v1561_v50 = vsel %vm390_vm12, 1.0, %v1769_v34  ;;  %v1367_v43 = vld [vmem:[%s2264_s6 + $0x58] sm:$0xff] }
  0x35   : > { %v2073_v49 = vsel %vm614_vm0, %v601_v45, 0  ;;  %vm470_vm14 = vcmp.eq.s32.totalorder %v1864_v2, %v1927_v32  ;;  %v1565_v51 = vsel %vm394_vm13, 1.0, %v1769_v34  ;;  %v426_v52 = vadd.f32 %v1561_v50, %v1549_v47 }
  0x36   : > { %681 = vmatpush1.bf16.msra.mxu1 %v2073_v49  ;;  %v2081_v30 = vpack.c.bf16 %v588_v46, %v584_v29  ;;  %vm474_vm15 = vcmp.eq.s32.totalorder %v1899_v16, %v1927_v32  ;;  %v430_v53 = vadd.f32 %v1565_v51, %v1553_v48  ;;  %v1573_v54 = vsel %vm470_vm14, 1.0, %v1769_v34 }
  0x37   : > { %v1577_v31 = vsel %vm474_vm15, 1.0, %v1769_v34  ;;  %vm550_vm1 = vcmp.eq.s32.totalorder %v1864_v2, %v1930_v33  ;;  %v506_v56 = vadd.f32 %v1573_v54, %v426_v52  ;;  %vm554_vm2 = vcmp.eq.s32.totalorder %v1899_v16, %v1930_v33 }
  0x38   : > { %641 = vmatprep.subr.bf16.mxu0 %v2081_v30  ;;  %v1585_v62 = vsel %vm550_vm1, 1.0, %v1769_v34  ;;  %vm319_vm3 = vcmp.eq.s32.totalorder %v1864_v2, %v1969_v55  ;;  %v510_v32 = vadd.f32 %v1577_v31, %v430_v53  ;;  %v1589_v3 = vsel %vm554_vm2, 1.0, %v1769_v34 }
  0x39   : > { %vm323_vm4 = vcmp.eq.s32.totalorder %v1899_v16, %v1969_v55  ;;  %v1546_v4 = vsel %vm319_vm3, 1.0, %v1769_v34  ;;  %v586_v7 = vadd.f32 %v1585_v62, %v506_v56  ;;  %vm387_vm5 = vcmp.eq.s32.totalorder %v1864_v2, %v1974_v57 }
  0x3a   : > { %v1550_v8 = vsel %vm323_vm4, 1.0, %v1769_v34  ;;  %vm391_vm6 = vcmp.eq.s32.totalorder %v1899_v16, %v1974_v57  ;;  %v590_v33 = vadd.f32 %v1589_v3, %v510_v32  ;;  %v1558_v9 = vsel %vm387_vm5, 1.0, %v1769_v34 }
  0x3b   : > { %v1562_v10 = vsel %vm391_vm6, 1.0, %v1769_v34  ;;  %vm467_vm7 = vcmp.eq.s32.totalorder %v1864_v2, %v1977_v58  ;;  %v423_v55 = vadd.f32 %v1558_v9, %v1546_v4  ;;  %vm471_vm8 = vcmp.eq.s32.totalorder %v1899_v16, %v1977_v58 }
  0x3c   : > { %v427_v12 = vadd.f32 %v1562_v10, %v1550_v8  ;;  %v1570_v13 = vsel %vm467_vm7, 1.0, %v1769_v34  ;;  %v598_v17 = vpack.c.bf16 %v590_v33, %v586_v7  ;;  %v1574_v18 = vsel %vm471_vm8, 1.0, %v1769_v34 }
  0x3d   : > { %vm547_vm9 = vcmp.eq.s32.totalorder %v1864_v2, %v1980_v59  ;;  %vm551_vm10 = vcmp.eq.s32.totalorder %v1899_v16, %v1980_v59  ;;  %v503_v57 = vadd.f32 %v1570_v13, %v423_v55  ;;  %vm321_vm11 = vcmp.eq.s32.totalorder %v1864_v2, %v1983_v60 }
  0x3e   : > { %v507_v19 = vadd.f32 %v1574_v18, %v427_v12  ;;  %v1582_v20 = vsel %vm547_vm9, 1.0, %v1769_v34  ;;  %v1586_v22 = vsel %vm551_vm10, 1.0, %v1769_v34  ;;  %682 = vmatprep.subr.bf16.mxu1 %v598_v17  ;;  %vm325_vm12 = vcmp.eq.s32.totalorder %v1899_v16, %v1983_v60 }
  0x3f   : > { %vm389_vm13 = vcmp.eq.s32.totalorder %v1864_v2, %v1990_v63  ;;  %vm393_vm14 = vcmp.eq.s32.totalorder %v1899_v16, %v1990_v63  ;;  %v583_v58 = vadd.f32 %v1582_v20, %v503_v57  ;;  %v1548_v15 = vsel %vm321_vm11, 1.0, %v1769_v34 }
  0x40   : > { %v587_v59 = vadd.f32 %v1586_v22, %v507_v19  ;;  %v1552_v24 = vsel %vm325_vm12, 1.0, %v1769_v34  ;;  %v1560_v25 = vsel %vm389_vm13, 1.0, %v1769_v34  ;;  %v1564_v11 = vsel %vm393_vm14, 1.0, %v1769_v34 }
  0x41   : > { %vm469_vm15 = vcmp.eq.s32.totalorder %v1864_v2, %v2024_v21  ;;  %vm473_vm1 = vcmp.eq.s32.totalorder %v1899_v16, %v2024_v21  ;;  %v425_v26 = vadd.f32 %v1560_v25, %v1548_v15  ;;  %v429_v14 = vadd.f32 %v1564_v11, %v1552_v24 }
  0x42   : > { %v595_v60 = vpack.c.bf16 %v587_v59, %v583_v58  ;;  %v1572_v63 = vsel %vm469_vm15, 1.0, %v1769_v34  ;;  %v1576_v35 = vsel %vm473_vm1, 1.0, %v1769_v34  ;;  %vm549_vm2 = vcmp.eq.s32.totalorder %v1864_v2, %v2032_v23 }
  0x43   : > { %vm553_vm3 = vcmp.eq.s32.totalorder %v1899_v16, %v2032_v23  ;;  %vm610_vm4 = vcmask 195584   ;;  %v505_v36 = vadd.f32 %v1572_v63, %v425_v26  ;;  %v509_v37 = vadd.f32 %v1576_v35, %v429_v14  ;;  %v793_v23 = vld [vmem:[%s2264_s6] sm:$0xff] }
  0x44   : > { %642 = vmatpush1.bf16.msra.mxu0 %v595_v60  ;;  %v1584_v38 = vsel %vm549_vm2, 1.0, %v1769_v34  ;;  %v1588_v21 = vsel %vm553_vm3, 1.0, %v1769_v34  ;;  %v1669_v34 = vld [vmem:[%s2259_s1] sm:$0xff]   ;;  %vm957_vm5 = vcmask 31744   ;;  %vm1114_vm6 = vcmask 261120  }
  0x45   : > { %1600 = vmatprep.subr.msk.bf16.mxu0 %vm614_vm0, %v1985_v61  ;;  %v585_v27 = vadd.f32 %v1584_v38, %v505_v36  ;;  %v589_v40 = vadd.f32 %v1588_v21, %v509_v37  ;;  %v1670_v61 = vld [vmem:[%s2259_s1 + $0x8] sm:$0xff]   ;;  %vm1257_vm7 = vcmask 130048   ;;  %vm1462_vm8 = vcmp.lt.s32.totalorder %v283_v0, 512 }
  0x47   : > { %1595 = vmatmul.mubr.msk.bf16.vlgmr.msra.gmra.mxu0 %vm610_vm4, %v603_v39  ;;  %v597_v16 = vpack.c.bf16 %v589_v40, %v585_v27 }
  0x48   : > { %846 = vmatpush1.bf16.msra.mxu0 %v2057_v5  ;;  %865 = vmatprep.mubr.bf16.mxu0 %v1768_v1  ;;  %v1204_v5 = vld [vmem:[%s2264_s6 + $0x28] sm:$0xff] }
  0x49   : > { %847 = vmatprep.subr.bf16.mxu0 %v2081_v30  ;;  %683 = vmatpush1.bf16.msra.mxu1 %v597_v16 }
  0x4a   : > { %1603 = vmatprep.subr.msk.bf16.mxu1 %vm614_vm0, %v2004_v6  ;;  %v796_v6 = vld [vmem:[%s2264_s6 + $0x18] sm:$0xff] }
  0x4b   : > { %814 = vperm.xlu1 %1668, %v796_v6  }
  0x4c   : > { %848 = vmatpush1.bf16.msra.mxu0 %v595_v60  ;;  %1597 = vmatmul.mubr.msk.bf16.vlgmr.msra.gmra.mxu1 %vm610_vm4, %v603_v39 }
  0x4d   : > { %899 = vmatpush1.bf16.msra.mxu1 %v2073_v49  ;;  %918 = vmatprep.mubr.bf16.mxu1 %v1768_v1 }
  0x4e   : > { %900 = vmatprep.subr.bf16.mxu1 %v598_v17 }
  0x4f   : > { %1601 = vmatmul.mubr.msk.bf16.vlgmr.msra.gmra.mxu0 %vm610_vm4, %v1669_v34  ;;  %799 = vperm.xlu1 %1668, %v793_v23  }
  0x50   : > { %875 = vmatprep.mubr.bf16.mxu0 %v1768_v1 }
  0x51   : > { %901 = vmatpush1.bf16.msra.mxu1 %v597_v16 }
  0x53   : > { %1208 = vperm.xlu1 %1668, %v1204_v5  }
  0x54   : > { %1604 = vmatmul.mubr.msk.bf16.vlgmr.msra.gmra.mxu1 %vm610_vm4, %v1669_v34 }
  0x55   : > { %928 = vmatprep.mubr.bf16.mxu1 %v1768_v1 }
  0x57   : > { %1602 = vmatmul.mubr.msk.bf16.gmra.mxu0 %vm610_vm4, %v1670_v61  ;;  %1228 = vperm.xlu1 %1668, %v1224_v41  }
  0x58   : > { %1009 = vmatprep.mubr.bf16.mxu0 %v1768_v1 }
  0x5b   : > { %1346 = vperm.xlu1 %1668, %v1343_v42  }
  0x5c   : > { %1605 = vmatmul.mubr.msk.bf16.gmra.mxu1 %vm610_vm4, %v1670_v61 }
  0x5d   : > { %1062 = vmatprep.mubr.bf16.mxu1 %v1768_v1 }
  0x5f   : > { %1370 = vperm.xlu1 %1668, %v1367_v43  }
  0x91   : > { %v608_v28 = vpop.permute.xlu0 %607 }
 0x107   : > { %v661_v44 = vpop.f32.mrf.mxu0 }
 0x108   : > { %v662_v45 = vadd.f32 %v661_v44, %v608_v28 }
 0x109   : > { %v663_v29 = vpop.f32.mrf.mxu0 }
 0x10a   : > { %v709_v46 = vmax.f32 %v662_v45, 0.0  ;;  %v664_v47 = vadd.f32 %v663_v29, %v608_v28 }
 0x10b   : > { %v665_v48 = vpop.f32.mrf.mxu0 }
 0x10c   : > { %v713_v49 = vsel %vm614_vm0, %v709_v46, -inf  ;;  %v710_v50 = vmax.f32 %v664_v47, 0.0  ;;  %v702_v51 = vpop.f32.mrf.mxu1 }
 0x10d   : > { %v714_v30 = vrot.slane %v713_v49, 4  ;;  %v666_v52 = vpop.f32.mrf.mxu0  ;;  %v703_v53 = vadd.f32 %v702_v51, %v608_v28 }
 0x10e   : > { %v720_v54 = vsel %vm614_vm0, %v710_v50, -inf  ;;  %v704_v62 = vpop.f32.mrf.mxu1 }
 0x10f   : > { %v715_v31 = vmax.f32 %v713_v49, %v714_v30  ;;  %v721_v56 = vrot.slane %v720_v54, 4  ;;  %v711_v32 = vmax.f32 %v703_v53, 0.0  ;;  %v705_v3 = vadd.f32 %v704_v62, %v608_v28 }
 0x110   : > { %v706_v8 = vpop.f32.mrf.mxu1 }
 0x111   : > { %v716_v4 = vrot.slane %v715_v31, 2  ;;  %v722_v7 = vmax.f32 %v720_v54, %v721_v56  ;;  %v727_v33 = vsel %vm614_vm0, %v711_v32, -inf  ;;  %v712_v9 = vmax.f32 %v705_v3, 0.0 }
 0x112   : > { %v728_v55 = vrot.slane %v727_v33, 4  ;;  %v707_v13 = vpop.f32.mrf.mxu1 }
 0x113   : > { %v717_v10 = vmax.f32 %v715_v31, %v716_v4  ;;  %v723_v12 = vrot.slane %v722_v7, 2  ;;  %v734_v17 = vsel %vm614_vm0, %v712_v9, -inf }
 0x114   : > { %v729_v57 = vmax.f32 %v727_v33, %v728_v55  ;;  %v735_v20 = vrot.slane %v734_v17, 4 }
 0x115   : > { %v718_v18 = vrot.slane %v717_v10, 1  ;;  %v724_v19 = vmax.f32 %v722_v7, %v723_v12 }
 0x116   : > { %v730_v58 = vrot.slane %v729_v57, 2  ;;  %v736_v15 = vmax.f32 %v734_v17, %v735_v20 }
 0x117   : > { %v719_v22 = vmax.f32 %v717_v10, %v718_v18  ;;  %v725_v59 = vrot.slane %v724_v19, 1 }
 0x118   : > { %v731_v25 = vmax.f32 %v729_v57, %v730_v58  ;;  %v737_v60 = vrot.slane %v736_v15, 2 }
 0x119   : > { %v741_v24 = vsub.f32 %v709_v46, %v719_v22  ;;  %v726_v11 = vmax.f32 %v724_v19, %v725_v59  ;;  %v1671_v22 = vld [vmem:[%s2263_s5] sm:$0xff]  }
 0x11a   : > { %v732_v14 = vrot.slane %v731_v25, 1  ;;  %v738_v35 = vmax.f32 %v736_v15, %v737_v60  ;;  %v867_v60 = vpop.f32.mrf.mxu0 }
 0x11b   : > { %v745_v26 = vmul.f32 1.442695, %v741_v24  ;;  %v742_v63 = vsub.f32 %v710_v50, %v726_v11  ;;  %v1672_v11 = vld [vmem:[%s2263_s5 + $0x8] sm:$0xff]  }
 0x11c   : > { %v733_v36 = vmax.f32 %v731_v25, %v732_v14  ;;  %v739_v38 = vrot.slane %v738_v35, 1  ;;  %v2211_v14 = vpop.f32.mrf.mxu1 }
 0x11d   : > { %1674 = vpow2.f32 %v745_v26  ;;  %v747_v37 = vmul.f32 1.442695, %v742_v63  ;;  %v869_v26 = vpop.f32.mrf.mxu0 }
 0x11e   : > { %v743_v21 = vsub.f32 %v711_v32, %v733_v36  ;;  %v740_v39 = vmax.f32 %v738_v35, %v739_v38  ;;  %v922_v35 = vpop.f32.mrf.mxu1 }
 0x11f   : > { %1676 = vpow2.f32 %v747_v37  ;;  %v871_v63 = vpop.f32.mrf.mxu0 }
 0x120   : > { %v749_v27 = vmul.f32 1.442695, %v743_v21  ;;  %v744_v40 = vsub.f32 %v712_v9, %v740_v39  ;;  %v924_v37 = vpop.f32.mrf.mxu1 }
 0x121   : > { %v873_v36 = vpop.f32.mrf.mxu0 }
 0x122   : > { %1678 = vpow2.f32 %v749_v27  ;;  %v751_v16 = vmul.f32 1.442695, %v744_v40  ;;  %v926_v21 = vpop.f32.mrf.mxu1 }
 0x123   : > { %v877_v38 = vpop.f32.mrf.mxu0 }
 0x124   : > { %1680 = vpow2.f32 %v751_v16  ;;  %v930_v27 = vpop.f32.mrf.mxu1 }
 0x125   : > { %v879_v39 = vpop.f32.mrf.mxu0 }
 0x126   : > { %v932_v16 = vpop.f32.mrf.mxu1 }
 0x127   : > { %v881_v40 = vpop.f32.mrf.mxu0 }
 0x12a   : > { %v1675_v34 = vpop.eup %1674 }
 0x12b   : > { %v753_v61 = vsel %vm614_vm0, %v1675_v34, 0.0 }
 0x12c   : > { %v1677_v6 = vpop.eup %1676  ;;  %v754_v23 = vrot.slane %v753_v61, 4 }
 0x12d   : > { %v760_v5 = vsel %vm614_vm0, %v1677_v6, 0.0 }
 0x12e   : > { %v755_v41 = vadd.f32 %v754_v23, %v753_v61  ;;  %v761_v42 = vrot.slane %v760_v5, 4  ;;  %v934_v61 = vpop.f32.mrf.mxu1 }
 0x12f   : > { %v1679_v43 = vpop.eup %1678 }
 0x130   : > { %v756_v28 = vrot.slane %v755_v41, 2  ;;  %v762_v44 = vadd.f32 %v761_v42, %v760_v5  ;;  %v767_v45 = vsel %vm614_vm0, %v1679_v43, 0.0  ;;  %v936_v5 = vpop.f32.mrf.mxu1  ;;  %v810_v42 = vpop.permute.xlu0 %809 }
 0x131   : > { %v1681_v29 = vpop.eup %1680  ;;  %v768_v47 = vrot.slane %v767_v45, 4 }
 0x132   : > { %v757_v46 = vadd.f32 %v756_v28, %v755_v41  ;;  %v763_v48 = vrot.slane %v762_v44, 2  ;;  %v774_v49 = vsel %vm614_vm0, %v1681_v29, 0.0  ;;  %vm964_vm0 = vcmask 1041408  }
 0x133   : > { %v769_v50 = vadd.f32 %v768_v47, %v767_v45  ;;  %v775_v51 = vrot.slane %v774_v49, 4 }
 0x134   : > { %v764_v30 = vadd.f32 %v763_v48, %v762_v44  ;;  %v758_v52 = vrot.slane %v757_v46, 1  ;;  %v805_v48 = vpop.permute.xlu0 %804 }
 0x135   : > { %v770_v53 = vrot.slane %v769_v50, 2  ;;  %v776_v31 = vadd.f32 %v775_v51, %v774_v49 }
 0x136   : > { %v765_v54 = vrot.slane %v764_v30, 1  ;;  %v759_v56 = vadd.f32 %v758_v52, %v757_v46  ;;  %v874_v52 = vadd.f32 %v873_v36, %v805_v48 }
 0x137   : > { %v771_v62 = vadd.f32 %v770_v53, %v769_v50  ;;  %v777_v32 = vrot.slane %v776_v31, 2  ;;  %v880_v53 = vadd.f32 %v879_v39, %v810_v42  ;;  %v925_v39 = vadd.f32 %v924_v37, %v805_v48 }
 0x138   : > { %v766_v3 = vadd.f32 %v765_v54, %v764_v30  ;;  %1682 = vrcp.f32 %v759_v56 }
 0x139   : > { %v778_v4 = vadd.f32 %v777_v32, %v776_v31  ;;  %v772_v7 = vrot.slane %v771_v62, 1  ;;  %v878_v31 = vadd.f32 %v877_v38, %v810_v42 }
 0x13a   : > { %1684 = vrcp.f32 %v766_v3 }
 0x13b   : > { %v779_v8 = vrot.slane %v778_v4, 1  ;;  %v773_v33 = vadd.f32 %v772_v7, %v771_v62 }
 0x13d   : > { %v780_v9 = vadd.f32 %v779_v8, %v778_v4  ;;  %1686 = vrcp.f32 %v773_v33  ;;  %v872_v33 = vadd.f32 %v871_v63, %v805_v48 }
 0x13f   : > { %1688 = vrcp.f32 %v780_v9 }
 0x145   : > { %v1683_v10 = vpop.eup %1682 }
 0x146   : > { %v785_v55 = vmul.f32 %v1683_v10, %v1675_v34  ;;  %v883_v34 = vpop.f32.mrf.mxu0 }
 0x147   : > { %v1685_v12 = vpop.eup %1684 }
 0x148   : > { %v786_v13 = vmul.f32 %v1685_v12, %v1677_v6  ;;  %v943_v17 = vpack.c.bf16 %v785_v55, %v785_v55 }
 0x14a   : > { %v944_v18 = vpack.c.bf16 %v786_v13, %v786_v13  ;;  %v1687_v57 = vpop.eup %1686  ;;  %v966_v19 = vsel %vm964_vm0, %v943_v17, 0 }
 0x14b   : > { %v787_v20 = vmul.f32 %v1687_v57, %v1679_v43  ;;  %v815_v43 = vpop.permute.xlu1 %814 }
 0x14c   : > { %1608 = vmatprep.subr.msk.bf16.mxu0 %vm964_vm0, %v944_v18  ;;  %v1689_v58 = vpop.eup %1688  ;;  %v882_v50 = vadd.f32 %v881_v40, %v815_v43  ;;  %v884_v54 = vadd.f32 %v883_v34, %v815_v43  ;;  %v935_v13 = vadd.f32 %v934_v61, %v815_v43 }
 0x14d   : > { %992 = vmatpush1.bf16.msra.mxu0 %v966_v19  ;;  %v788_v59 = vmul.f32 %v1689_v58, %v1681_v29  ;;  %v945_v15 = vpack.c.bf16 %v787_v20, %v787_v20  ;;  %v927_v20 = vadd.f32 %v926_v21, %v805_v48  ;;  %v937_v58 = vadd.f32 %v936_v5, %v815_v43  ;;  %v1673_v21 = vld [vmem:[%s2261_s3] sm:$0xff]   ;;  %v1214_v5 = vpop.permute.xlu0 %1213 }
 0x14f   : > { %v946_v24 = vpack.c.bf16 %v788_v59, %v788_v59  ;;  %v972_v25 = vsel %vm964_vm0, %v945_v15, 0  ;;  %v800_v49 = vpop.permute.xlu1 %799  ;;  %v931_v15 = vadd.f32 %v930_v27, %v810_v42 }
 0x150   : > { %1609 = vmatmul.mubr.msk.bf16.vlgmr.msra.gmra.mxu0 %vm957_vm5, %v1671_v22  ;;  %v870_v3 = vadd.f32 %v869_v26, %v800_v49  ;;  %v868_v17 = vadd.f32 %v867_v60, %v800_v49  ;;  %v923_v26 = vadd.f32 %v922_v35, %v800_v49  ;;  %v921_v27 = vadd.f32 %v2211_v14, %v800_v49 }
 0x151   : > { %1019 = vmatprep.mubr.bf16.mxu0 %v1768_v1  ;;  %1611 = vmatprep.subr.msk.bf16.mxu1 %vm964_vm0, %v946_v24 }
 0x152   : > { %1045 = vmatpush1.bf16.msra.mxu1 %v972_v25 }
 0x153   : > { %v1209_v14 = vpop.permute.xlu1 %1208 }
 0x155   : > { %1612 = vmatmul.mubr.msk.bf16.vlgmr.msra.gmra.mxu1 %vm957_vm5, %v1671_v22  ;;  %v933_v22 = vadd.f32 %v932_v16, %v810_v42 }
 0x156   : > { %1072 = vmatprep.mubr.bf16.mxu1 %v1768_v1 }
 0x157   : > { %v1229_v48 = vpop.permute.xlu1 %1228 }
 0x158   : > { %1610 = vmatmul.mubr.msk.bf16.gmra.mxu0 %vm957_vm5, %v1672_v11 }
 0x159   : > { %1150 = vmatprep.mubr.bf16.mxu0 %v1768_v1 }
 0x15d   : > { %1613 = vmatmul.mubr.msk.bf16.gmra.mxu1 %vm957_vm5, %v1672_v11 }
 0x15e   : > { %1193 = vmatprep.mubr.bf16.mxu1 %v1768_v1 }
 0x210   : > { %v1011_v6 = vpop.f32.mrf.mxu0 }
 0x211   : > { %v1083_v24 = vmul.f32 %v1011_v6, %v868_v17 }
 0x212   : > { %v1013_v23 = vpop.f32.mrf.mxu0 }
 0x213   : > { %v1084_v55 = vmul.f32 %v1013_v23, %v870_v3 }
 0x214   : > { %v1015_v41 = vpop.f32.mrf.mxu0 }
 0x215   : > { %v1064_v28 = vpop.f32.mrf.mxu1  ;;  %v1087_v18 = vmul.f32 %v1015_v41, %v872_v33 }
 0x216   : > { %v1017_v44 = vpop.f32.mrf.mxu0  ;;  %v1085_v23 = vmul.f32 %v1064_v28, %v921_v27 }
 0x217   : > { %v1066_v45 = vpop.f32.mrf.mxu1  ;;  %v1088_v4 = vmul.f32 %v1017_v44, %v874_v52  ;;  %v1099_v60 = vpack.c.bf16 %v1087_v18, %v1083_v24 }
 0x218   : > { %v1021_v29 = vpop.f32.mrf.mxu0  ;;  %v1086_v34 = vmul.f32 %v1066_v45, %v923_v26  ;;  %v1234_v45 = vpop.permute.xlu0 %1233 }
 0x219   : > { %v1068_v46 = vpop.f32.mrf.mxu1  ;;  %v1091_v9 = vmul.f32 %v1021_v29, %v878_v31  ;;  %v1100_v59 = vpack.c.bf16 %v1088_v4, %v1084_v55 }
 0x21a   : > { %v1023_v47 = vpop.f32.mrf.mxu0  ;;  %v1089_v16 = vmul.f32 %v1068_v46, %v925_v39 }
 0x21b   : > { %v1070_v30 = vpop.f32.mrf.mxu1  ;;  %v1092_v7 = vmul.f32 %v1023_v47, %v880_v53 }
 0x21c   : > { %v1025_v51 = vpop.f32.mrf.mxu0  ;;  %v1090_v63 = vmul.f32 %v1070_v30, %v927_v20  ;;  %v1101_v37 = vpack.c.bf16 %v1089_v16, %v1085_v23 }
 0x21d   : > { %v1074_v56 = vpop.f32.mrf.mxu1  ;;  %v1095_v62 = vmul.f32 %v1025_v51, %v882_v50 }
 0x21e   : > { %v1027_v32 = vpop.f32.mrf.mxu0  ;;  %v1093_v40 = vmul.f32 %v1074_v56, %v931_v15  ;;  %v1102_v35 = vpack.c.bf16 %v1090_v63, %v1086_v34 }
 0x21f   : > { %v1096_v8 = vmul.f32 %v1027_v32, %v884_v54  ;;  %v1076_v10 = vpop.f32.mrf.mxu1  ;;  %v1103_v57 = vpack.c.bf16 %v1095_v62, %v1091_v9 }
 0x220   : > { %v1094_v36 = vmul.f32 %v1076_v10, %v933_v22 }
 0x221   : > { %v1104_v12 = vpack.c.bf16 %v1096_v8, %v1092_v7  ;;  %v1078_v19 = vpop.f32.mrf.mxu1 }
 0x222   : > { %v1097_v25 = vmul.f32 %v1078_v19, %v935_v13  ;;  %v1252_v19 = vld [vmem:[%s2262_s4] sm:$0xf] }
 0x223   : > { %1130 = vmatprep.subr.bf16.mxu0 %v1104_v12  ;;  %v1080_v11 = vpop.f32.mrf.mxu1 }
 0x224   : > { %1131 = vmatpush1.bf16.msra.mxu0 %v1103_v57  ;;  %v1098_v38 = vmul.f32 %v1080_v11, %v937_v58  ;;  %v1105_v6 = vpack.c.bf16 %v1097_v25, %v1093_v40  ;;  %v1357_v25 = vpop.permute.xlu0 %1356 }
 0x225   : > { %1132 = vmatprep.subr.bf16.mxu0 %v1100_v59  ;;  %v1347_v59 = vpop.permute.xlu1 %1346 }
 0x226   : > { %v1106_v61 = vpack.c.bf16 %v1098_v38, %v1094_v36 }
 0x228   : > { %1133 = vmatpush1.bf16.msra.mxu0 %v1099_v60  ;;  %1173 = vmatprep.subr.bf16.mxu1 %v1106_v61 }
 0x229   : > { %1174 = vmatpush1.bf16.msra.mxu1 %v1105_v6  ;;  %v1371_v40 = vpop.permute.xlu1 %1370 }
 0x22a   : > { %1175 = vmatprep.subr.bf16.mxu1 %v1102_v35 }
 0x22b   : > { %1615 = vmatmul.mubr.msk.bf16.vlgmr.msra.gmra.mxu0 %vm1114_vm6, %v1673_v21 }
 0x22c   : > { %1293 = vmatprep.mubr.bf16.mxu0 %v1768_v1 }
 0x22d   : > { %1176 = vmatpush1.bf16.msra.mxu1 %v1101_v37 }
 0x230   : > { %1616 = vmatmul.mubr.msk.bf16.vlgmr.msra.gmra.mxu1 %vm1114_vm6, %v1673_v21 }
 0x231   : > { %1334 = vmatprep.mubr.bf16.mxu1 %v1768_v1 }
 0x2eb   : > { %v1152_v41 = vpop.f32.mrf.mxu0 }
 0x2ec   : > { %v1216_v29 = vmul.f32 %v1209_v14, %v1152_v41 }
 0x2ed   : > { %v1154_v42 = vpop.f32.mrf.mxu0 }
 0x2ee   : > { %v1217_v43 = vmul.f32 %v1209_v14, %v1154_v42  ;;  %v1236_v52 = vadd.f32 %v1229_v48, %v1216_v29 }
 0x2ef   : > { %v1156_v44 = vpop.f32.mrf.mxu0 }
 0x2f0   : > { %v1220_v46 = vmul.f32 %v1214_v5, %v1156_v44  ;;  %v1195_v28 = vpop.f32.mrf.mxu1  ;;  %v1237_v30 = vadd.f32 %v1229_v48, %v1217_v43  ;;  %v1244_v7 = vmax.f32 %v1236_v52, 0.0 }
 0x2f1   : > { %v1158_v47 = vpop.f32.mrf.mxu0  ;;  %v1218_v1 = vmul.f32 %v1209_v14, %v1195_v28 }
 0x2f2   : > { %v1240_v49 = vadd.f32 %v1234_v45, %v1220_v46  ;;  %v1221_v50 = vmul.f32 %v1214_v5, %v1158_v47  ;;  %v1197_v51 = vpop.f32.mrf.mxu1  ;;  %v1245_v32 = vmax.f32 %v1237_v30, 0.0 }
 0x2f3   : > { %v1219_v53 = vmul.f32 %v1209_v14, %v1197_v51  ;;  %v1238_v10 = vadd.f32 %v1229_v48, %v1218_v1 }
 0x2f4   : > { %v1241_v54 = vadd.f32 %v1234_v45, %v1221_v50  ;;  %v1199_v31 = vpop.f32.mrf.mxu1  ;;  %v1248_v56 = vmax.f32 %v1240_v49, 0.0 }
 0x2f5   : > { %v1222_v62 = vmul.f32 %v1214_v5, %v1199_v31  ;;  %v1239_v8 = vadd.f32 %v1229_v48, %v1219_v53  ;;  %v1246_v20 = vmax.f32 %v1238_v10, 0.0 }
 0x2f6   : > { %v1249_v3 = vmax.f32 %v1241_v54, 0.0  ;;  %v1201_v4 = vpop.f32.mrf.mxu1  ;;  %v1253_v12 = vpack.c.bf16 %v1248_v56, %v1244_v7 }
 0x2f7   : > { %v1242_v33 = vadd.f32 %v1234_v45, %v1222_v62  ;;  %v1223_v9 = vmul.f32 %v1214_v5, %v1201_v4  ;;  %v1247_v18 = vmax.f32 %v1239_v8, 0.0  ;;  %v1405_v62 = vpop.permute.xlu0 %1404 }
 0x2f8   : > { %v1254_v55 = vpack.c.bf16 %v1249_v3, %v1245_v32 }
 0x2f9   : > { %v1243_v13 = vadd.f32 %v1234_v45, %v1223_v9  ;;  %v1250_v17 = vmax.f32 %v1242_v33, 0.0 }
 0x2fa   : > { %1275 = vmatprep.subr.bf16.mxu0 %v1254_v55 }
 0x2fb   : > { %v1251_v57 = vmax.f32 %v1243_v13, 0.0  ;;  %1276 = vmatpush1.bf16.msra.mxu0 %v1253_v12  ;;  %v1255_v58 = vpack.c.bf16 %v1250_v17, %v1246_v20 }
 0x2fd   : > { %v1256_v22 = vpack.c.bf16 %v1251_v57, %v1247_v18 }
 0x2fe   : > { %1617 = vmatmul.mubr.msk.bf16.vlgmr.msra.gmra.mxu0 %vm1257_vm7, %v1252_v19 }
 0x2ff   : > { %1316 = vmatprep.subr.bf16.mxu1 %v1256_v22 }
 0x300   : > { %1317 = vmatpush1.bf16.msra.mxu1 %v1255_v58 }
 0x303   : > { %1618 = vmatmul.mubr.msk.bf16.vlgmr.msra.gmra.mxu1 %vm1257_vm7, %v1252_v19 }
 0x3be   : > { %v1295_v15 = vpop.f32.mrf.mxu0 }
 0x3bf   : > { %v1349_v24 = vmul.f32 %v1347_v59, %v1295_v15 }
 0x3c0   : > { %v1297_v11 = vpop.f32.mrf.mxu0 }
 0x3c1   : > { %v1359_v26 = vadd.f32 %v1357_v25, %v1349_v24  ;;  %v1350_v63 = vmul.f32 %v1347_v59, %v1297_v11 }
 0x3c2   : > { %v1299_v36 = vpop.f32.mrf.mxu0 }
 0x3c3   : > { %v1363_v38 = vmax.f32 %v1359_v26, 0.0  ;;  %v1336_v39 = vpop.f32.mrf.mxu1  ;;  %v1360_v60 = vadd.f32 %v1357_v25, %v1350_v63 }
 0x3c4   : > { %v1351_v34 = vmul.f32 %v1347_v59, %v1336_v39  ;;  %v1300_v61 = vpop.f32.mrf.mxu0 }
 0x3c5   : > { %v1373_v21 = vmul.f32 %v1371_v40, %v1363_v38  ;;  %v1364_v27 = vmax.f32 %v1360_v60, 0.0  ;;  %v1338_v16 = vpop.f32.mrf.mxu1  ;;  %v1770_v60 = vmov 1966171168  }
 0x3c6   : > { %v1361_v6 = vadd.f32 %v1357_v25, %v1351_v34  ;;  %v1352_v35 = vmul.f32 %v1347_v59, %v1338_v16 }
 0x3c7   : > { %v1377_v23 = vrot.slane %v1373_v21, 4  ;;  %v1374_v37 = vmul.f32 %v1371_v40, %v1364_v27  ;;  %v1340_v5 = vpop.f32.mrf.mxu1 }
 0x3c8   : > { %v1365_v41 = vmax.f32 %v1361_v6, 0.0  ;;  %v1362_v14 = vadd.f32 %v1357_v25, %v1352_v35 }
 0x3c9   : > { %v1378_v42 = vadd.f32 %v1377_v23, %v1373_v21  ;;  %v1383_v43 = vrot.slane %v1374_v37, 4  ;;  %v1341_v44 = vpop.f32.mrf.mxu1 }
 0x3ca   : > { %v1375_v45 = vmul.f32 %v1371_v40, %v1365_v41  ;;  %v1366_v29 = vmax.f32 %v1362_v14, 0.0 }
 0x3cb   : > { %v1379_v46 = vrot.slane %v1378_v42, 2  ;;  %v1384_v28 = vadd.f32 %v1383_v43, %v1374_v37 }
 0x3cc   : > { %v1389_v47 = vrot.slane %v1375_v45, 4  ;;  %v1376_v48 = vmul.f32 %v1371_v40, %v1366_v29  ;;  %v1438_v40 = vunpack.c.l.s4 %v1770_v60 }
 0x3cd   : > { %v1380_v49 = vadd.f32 %v1379_v46, %v1378_v42  ;;  %v1385_v50 = vrot.slane %v1384_v28, 2 }
 0x3ce   : > { %v1390_v30 = vadd.f32 %v1389_v47, %v1375_v45  ;;  %v1395_v51 = vrot.slane %v1376_v48, 4  ;;  %v1439_v34 = vunpack.c.0.s8 %v1438_v40 }
 0x3cf   : > { %v1381_v52 = vrot.slane %v1380_v49, 1  ;;  %v1386_v53 = vadd.f32 %v1385_v50, %v1384_v28 }
 0x3d0   : > { %v1391_v54 = vrot.slane %v1390_v30, 2  ;;  %v1396_v1 = vadd.f32 %v1395_v51, %v1376_v48  ;;  %v1442_v16 = vsub.s32 %v1439_v34, %v1864_v2 }
 0x3d1   : > { %v1382_v31 = vadd.f32 %v1381_v52, %v1380_v49  ;;  %v1387_v56 = vrot.slane %v1386_v53, 1 }
 0x3d2   : > { %v1392_v32 = vadd.f32 %v1391_v54, %v1390_v30  ;;  %v1397_v3 = vrot.slane %v1396_v1, 2 }
 0x3d3   : > { %v1407_v4 = vadd.f32 %v1405_v62, %v1382_v31  ;;  %v1388_v7 = vadd.f32 %v1387_v56, %v1386_v53 }
 0x3d4   : > { %v1393_v8 = vrot.slane %v1392_v32, 1  ;;  %v1398_v33 = vadd.f32 %v1397_v3, %v1396_v1 }
 0x3d5   : > { %v1411_v9 = vsub.f32 0.0, %v1407_v4  ;;  %v1408_v10 = vadd.f32 %v1405_v62, %v1388_v7 }
 0x3d6   : > { %v1394_v55 = vadd.f32 %v1393_v8, %v1392_v32  ;;  %v1399_v12 = vrot.slane %v1398_v33, 1 }
 0x3d7   : > { %v1415_v13 = vmul.f32 1.442695, %v1411_v9  ;;  %v1412_v17 = vsub.f32 0.0, %v1408_v10 }
 0x3d8   : > { %v1409_v18 = vadd.f32 %v1405_v62, %v1394_v55  ;;  %v1400_v57 = vadd.f32 %v1399_v12, %v1398_v33 }
 0x3d9   : > { %1690 = vpow2.f32 %v1415_v13  ;;  %v1417_v19 = vmul.f32 1.442695, %v1412_v17 }
 0x3da   : > { %v1413_v20 = vsub.f32 0.0, %v1409_v18  ;;  %v1410_v22 = vadd.f32 %v1405_v62, %v1400_v57 }
 0x3db   : > { %1692 = vpow2.f32 %v1417_v19 }
 0x3dc   : > { %v1419_v58 = vmul.f32 1.442695, %v1413_v20  ;;  %v1414_v59 = vsub.f32 0.0, %v1410_v22 }
 0x3de   : > { %1694 = vpow2.f32 %v1419_v58  ;;  %v1421_v15 = vmul.f32 1.442695, %v1414_v59 }
 0x3e0   : > { %1696 = vpow2.f32 %v1421_v15 }
 0x3e6   : > { %v1691_v24 = vpop.eup %1690 }
 0x3e7   : > { %v1423_v11 = vadd.f32 1.0, %v1691_v24 }
 0x3e8   : > { %v1693_v25 = vpop.eup %1692 }
 0x3e9   : > { %v1424_v26 = vadd.f32 1.0, %v1693_v25 }
 0x3eb   : > { %v1695_v63 = vpop.eup %1694  ;;  %1698 = vrcp.f32 %v1424_v26 }
 0x3ec   : > { %1700 = vrcp.f32 %v1423_v11  ;;  %v1425_v36 = vadd.f32 1.0, %v1695_v63 }
 0x3ed   : > { %v1697_v38 = vpop.eup %1696 }
 0x3ee   : > { %v1426_v39 = vadd.f32 1.0, %v1697_v38  ;;  %1702 = vrcp.f32 %v1425_v36 }
 0x3f0   : > { %1704 = vrcp.f32 %v1426_v39 }
 0x3f8   : > { %v1699_v61 = vpop.eup %1698 }
 0x3f9   : > { %v1701_v21 = vpop.eup %1700 }
 0x3fa   : > { %v1435_v27 = vcombine.low %v1701_v21, %v1699_v61 }
 0x3fb   : > { %v1703_v6 = vpop.eup %1702 }
 0x3fc   : > { %v1443_v37 = vrot.slane %v1435_v27, %v1442_v16 }
 0x3fd   : > { %v1705_v35 = vpop.eup %1704 }
 0x3fe   : > { %v1436_v23 = vcombine.low %v1703_v6, %v1705_v35 }
 0x400   : > { %v1450_v5 = vrot.slane %v1436_v23, %v1442_v16 }
 0x402   : > { %v1451_v41 = vcombine.low %v1443_v37, %v1450_v5 }
 0x404   : > { %v1458_v14 = vrot.slane %v1451_v41, %v1442_v16 }
 0x406   : > { %1464 = vst.msk [vmem:[%s272_s19] sm:$0xf] %vm1462_vm8, %v1458_v14 }
 0x407   : > { %1719 = shalt.err (!%p1716_p3)
}
 0x408   : > { %s1720_s14 = scalar_lea.hbm %s1478_s23, 64  ;;  %s1724_s17 = scalar_lea.hbm %s2265_s7, 512 }
 0x409   : > { %p1721_p4 = scmp.ne.s32.totalorder %s1478_s23, %s1720_s14  ;;  %p1725_p9 = scmp.lt.s32.totalorder %s1478_s23, %s2265_s7 }
 0x40a   : > { %p1726_p10 = scmp.lt.s32.totalorder %s1724_s17, %s1720_s14 }
 0x40b   : > { %p1722_p7 = pnand %p1721_p4, %p1850_p5 }
 0x40c   : > { %p1727_p11 = por %p1726_p10, %p1725_p9 }
 0x40d   : > { %p1723_p8 = pneg %p1722_p7 }
 0x40f   : > { %p1728_p12 = pnand %p1727_p11, %p1723_p8 }
 0x411   : > { %1731 = shalt.err (!%p1728_p12)
}
 0x412   : > { %1625 = dma.vmem_to_hbm [thread:$0]  (%p1850_p5), %s1481_s20, 64, %s1478_s23, %s1466_s29  }
 0x413 PF: > { %p1631_p13 = scmp.ge.s32.totalorder %s1766_s27, 2  ;;  %s1492_s21 = sand.u32 1, %s1754_s24  }
 0x414   : > { %s1493_s22 = scalar_lea.sflag [#allocation3], %s1492_s21 }
 0x415   : > { %p1628_p0 = pnand %p1631_p13, %p1854_p6 }
 0x417   : > { %p1629_p1 = pneg %p1628_p0 }
 0x419   : > { %1749 = dma.done.wait (%p1629_p1), %s1493_s22, 64  }
 0x41a   : > { %1751 = vsyncadd (%p1629_p1), %s1493_s22, 4294967232  ;;  %p17_p2 = scmp.ge.s32.totalorder %s1837_s30, 10   ;;  %s2268_s24 = smov %s1758_s25 }
 0x41b   : > { %s2269_s25 = smov %s1762_s26  ;;  %s2270_s26 = smov %s1848_s10 }
 0x41c   : > { %s2271_s27 = smov %s1837_s30  ;;  %19 = sbr.rel (!%p17_p2) target bundleno = 3 (0x3), region = 83 }
 0x421   :  { %1498 = vsyncpa [#allocation3], 1 }
 0x422   :  { %1500 = vsyncpa [#allocation3 + $0x1], 1 }

</bundles_post_ra>
